<compile_context>
chip_gen: v6e
topology: v6e:2x2x1
jax: 0.10.0
libtpu: 0.0.40
codegen_flags: <defaults>
</compile_context>

<pallas_src>
import functools

import jax
import jax.numpy as jnp
from jax.experimental import pallas as pl
from jax.experimental.pallas import tpu as pltpu


def _round_up(x, m):
    return ((x + m - 1) // m) * m


# --------------------------------------------------------------------------
# Generation-aware hardware queries.
# --------------------------------------------------------------------------
def _device_kind():
    try:
        return (getattr(jax.devices()[0], "device_kind", "") or "").lower()
    except Exception:
        return ""


def _chip_vmem_bytes(kind):
    """Physical per-TensorCore VMEM, with a safe generation-aware fallback."""
    try:
        cap = int(pltpu.get_tpu_info().vmem_capacity_bytes)
        if cap > 0:
            return cap
    except Exception:
        pass
    if "v7" in kind:
        return 64 << 20          # v7x: 64 MiB per TensorCore
    return 128 << 20             # v5e / v6e: 128 MiB


def _default_block_rows(kind):
    if "v5" in kind:
        return 128   # 1 TC, 4x128^2 MXU: 128 rows already keep it full
    if "v6" in kind:
        return 512   # 918 TF/s MXU: amortise the ~0.35us/step overhead
    return 256       # v7x / unknown


def _is_multi_tc(kind):
    return "v7" in kind          # v7x has 2 TensorCores per chip


# --------------------------------------------------------------------------
# Kernels.
# --------------------------------------------------------------------------
def _ffn_fused_kernel(x_ref, w1_ref, b1_ref, w2_ref, b2_ref, w3_ref, b3_ref,
                      o_ref, *, post_normalize):
    mm_dtype = w1_ref.dtype
    # Cast the activations to the matmul operand dtype *inside* the kernel
    # (VPU work hidden under the MXU) rather than as a separate XLA HBM pass.
    x = x_ref[...].astype(mm_dtype)

    # linear1 + relu   (dropout p=0 -> identity)
    h1 = jnp.dot(x, w1_ref[...], preferred_element_type=jnp.float32)
    h1 = jnp.maximum(h1 + b1_ref[...], 0.0)

    # linear2 + relu
    h2 = jnp.dot(h1.astype(mm_dtype), w2_ref[...],
                 preferred_element_type=jnp.float32)
    h2 = jnp.maximum(h2 + b2_ref[...], 0.0)

    # linear3
    h3 = jnp.dot(h2.astype(mm_dtype), w3_ref[...],
                 preferred_element_type=jnp.float32) + b3_ref[...]

    if post_normalize:
        # F.normalize(p=2, dim=-1): x / max(||x||, 1e-12)
        #   == x * rsqrt(max(||x||^2, 1e-24))      (rsqrt -> EUP slot)
        ss = jnp.sum(h3 * h3, axis=-1, keepdims=True)
        h3 = h3 * jax.lax.rsqrt(jnp.maximum(ss, 1e-24))

    o_ref[...] = h3.astype(o_ref.dtype)


def _linear_kernel(x_ref, w_ref, b_ref, o_ref, acc_ref, *, relu, normalize):
    """One K/N-tiled linear layer: acc += x@W panel, finalize = +bias
    (+relu | +L2 normalize).  Used by the weight-streaming path."""
    @pl.when(pl.program_id(2) == 0)
    def _():
        acc_ref[...] = jnp.zeros_like(acc_ref)

    acc_ref[...] += jnp.dot(x_ref[...].astype(w_ref.dtype), w_ref[...],
                            preferred_element_type=jnp.float32)

    @pl.when(pl.program_id(2) == pl.num_programs(2) - 1)
    def _():
        y = acc_ref[...] + b_ref[...]
        if relu:
            y = jnp.maximum(y, 0.0)
        if normalize:
            ss = jnp.sum(y * y, axis=-1, keepdims=True)
            y = y * jax.lax.rsqrt(jnp.maximum(ss, 1e-24))
        o_ref[...] = y.astype(o_ref.dtype)


# --------------------------------------------------------------------------
# Parameter preparation (pad + cast ONCE, not per call).
# --------------------------------------------------------------------------
def prepare_ffn_params(params, matmul_dtype=jnp.bfloat16):
    """Pad (lane-align) and cast the FFN parameters once.

    Weights are stored (in, out) so the kernels compute x @ W.  dim_hidden and
    dim_out are zero-padded up to multiples of 128 lanes: padded rows/columns
    and zero-padded biases are mathematically inert (relu(0)=0, contribute 0
    to the matmuls and to the L2 norm) and keep every MXU push / output store
    lane-dense.
    """
    # TODO(synk): optional fp8 weights (v7x) / int8 + per-channel scales
    # (v5e/v6e) would halve resident-weight VMEM and DMA; not implemented.
    w1, b1, w2, b2, w3, b3 = params
    dim_hidden = int(w1.shape[0])
    dim_out = int(w3.shape[1])
    hp = _round_up(dim_hidden, 128)
    dp = _round_up(dim_out, 128)

    def pad2(w, rows, cols):
        return jnp.pad(w, ((0, rows - w.shape[0]), (0, cols - w.shape[1])))

    def pad1(b, n):
        return jnp.pad(b, ((0, n - b.shape[0]),))

    mm = jnp.dtype(matmul_dtype)
    return {
        "_prepared": True,
        "dim_hidden": dim_hidden,
        "dim_out": dim_out,
        "hp": hp,
        "dp": dp,
        "matmul_dtype": mm,
        "w1": pad2(w1, hp, hp).astype(mm),
        "b1": pad1(b1, hp).astype(jnp.float32).reshape(1, hp),
        "w2": pad2(w2, hp, hp).astype(mm),
        "b2": pad1(b2, hp).astype(jnp.float32).reshape(1, hp),
        "w3": pad2(w3, hp, dp).astype(mm),
        "b3": pad1(b3, dp).astype(jnp.float32).reshape(1, dp),
    }


# --------------------------------------------------------------------------
# Fused resident-weight path.
# --------------------------------------------------------------------------
def _run_fused(x2d, p, *, bm, post_normalize, out_dtype, vmem_limit):
    m_pad, hp = x2d.shape
    dp = p["dp"]
    mm_it = p["matmul_dtype"].itemsize
    x_it = x2d.dtype.itemsize
    out_it = jnp.dtype(out_dtype).itemsize

    flops = (2 * m_pad * (2 * hp * hp + hp * dp)
             + 4 * m_pad * hp + 3 * m_pad * dp)
    bytes_accessed = (m_pad * hp * x_it
                      + (2 * hp * hp + hp * dp) * mm_it
                      + (2 * hp + dp) * 4
                      + m_pad * dp * out_it)
    cost = pl.CostEstimate(flops=flops,
                           transcendentals=m_pad if post_normalize else 0,
                           bytes_accessed=bytes_accessed)

    kernel = functools.partial(_ffn_fused_kernel, post_normalize=post_normalize)
    # Grid-invariant blocks: DMA'd once, double-buffered by default (the 2x
    # VMEM is accounted for in the budget that chose this path).
    const = lambda shape: pl.BlockSpec(shape, lambda i: (0, 0))

    return pl.pallas_call(
        kernel,
        out_shape=jax.ShapeDtypeStruct((m_pad, dp), out_dtype),
        grid_spec=pltpu.PrefetchScalarGridSpec(
            num_scalar_prefetch=0,
            grid=(m_pad // bm,),
            in_specs=[
                pl.BlockSpec((bm, hp), lambda i: (i, 0)),   # x row tile
                const((hp, hp)), const((1, hp)),            # w1, b1
                const((hp, hp)), const((1, hp)),            # w2, b2
                const((hp, dp)), const((1, dp)),            # w3, b3
            ],
            out_specs=pl.BlockSpec((bm, dp), lambda i: (i, 0)),
        ),
        compiler_params=pltpu.CompilerParams(
            # TODO(synk): on v7x an explicit core split (CORE_PARALLEL /
            # pl.core_map) would guarantee sharding across both TensorCores.
            dimension_semantics=("parallel",),
            vmem_limit_bytes=vmem_limit,
        ),
        cost_estimate=cost,
    )(x2d, p["w1"], p["b1"], p["w2"], p["b2"], p["w3"], p["b3"])


# --------------------------------------------------------------------------
# Weight-streaming path (large dim_hidden / small-VMEM chips such as v7x).
# --------------------------------------------------------------------------
def _run_linear(x2d, w, b_row, *, relu, normalize, bm, bn, bk, out_dtype,
                vmem_cap):
    M, K = x2d.shape
    N = w.shape[1]
    assert M % bm == 0 and K % bk == 0 and N % bn == 0
    if normalize:
        assert bn == N, "L2 normalize needs the full output row in one tile"

    need = (2 * bm * bk * x2d.dtype.itemsize        # x tiles (double buffered)
            + 2 * bk * bn * w.dtype.itemsize        # weight panels
            + 2 * bn * 4                            # bias panels
            + 2 * bm * bn * jnp.dtype(out_dtype).itemsize
            + bm * bn * 4)                          # f32 accumulator
    vmem_limit = int(max(16 << 20,
                         min(2 * need + (4 << 20), int(0.9 * vmem_cap))))

    kernel = functools.partial(_linear_kernel, relu=relu, normalize=normalize)
    return pl.pallas_call(
        kernel,
        out_shape=jax.ShapeDtypeStruct((M, N), out_dtype),
        grid_spec=pltpu.PrefetchScalarGridSpec(
            num_scalar_prefetch=0,
            grid=(M // bm, N // bn, K // bk),
            in_specs=[
                pl.BlockSpec((bm, bk), lambda i, j, k: (i, k)),
                pl.BlockSpec((bk, bn), lambda i, j, k: (k, j)),
                pl.BlockSpec((1, bn), lambda i, j, k: (0, j)),
            ],
            out_specs=pl.BlockSpec((bm, bn), lambda i, j, k: (i, j)),
            scratch_shapes=[pltpu.VMEM((bm, bn), jnp.float32)],
        ),
        compiler_params=pltpu.CompilerParams(
            dimension_semantics=("parallel", "parallel", "arbitrary"),
            vmem_limit_bytes=vmem_limit,
        ),
    )(x2d, w, b_row)


def _run_streaming(x2d, p, *, bm, post_normalize, out_dtype, vmem_cap, panel):
    hp, dp = p["hp"], p["dp"]
    mm = p["matmul_dtype"]
    if panel is None:
        panel = 512 if hp % 512 == 0 else (256 if hp % 256 == 0 else 128)
    bk = bn = panel
    # Intermediate activations stay in the matmul dtype (halves the HBM
    # traffic between the three streamed matmuls).
    h1 = _run_linear(x2d, p["w1"], p["b1"], relu=True, normalize=False,
                     bm=bm, bn=bn, bk=bk, out_dtype=mm, vmem_cap=vmem_cap)
    h2 = _run_linear(h1, p["w2"], p["b2"], relu=True, normalize=False,
                     bm=bm, bn=bn, bk=bk, out_dtype=mm, vmem_cap=vmem_cap)
    return _run_linear(h2, p["w3"], p["b3"], relu=False,
                       normalize=post_normalize,
                       bm=bm, bn=dp, bk=bk, out_dtype=out_dtype,
                       vmem_cap=vmem_cap)


# --------------------------------------------------------------------------
# Public wrapper.
# --------------------------------------------------------------------------
def ffn_layer(x, params, *, post_normalize=True, block_rows=None,
              matmul_dtype=jnp.bfloat16, force_stream=False,
              stream_panel=None):
    """x: (..., dim_hidden) -> (..., dim_out), matching FFNLayer.forward
    (activation='relu', dropout=0.0).

    `params` is either the raw 6-tuple (w1,b1,w2,b2,w3,b3) with weights stored
    (in, out), or the result of prepare_ffn_params() (preferred: pads and
    casts the weights once instead of on every call).  matmul_dtype=jnp.float32
    is an accuracy-check path only, not a performance path.
    """
    if isinstance(params, dict) and params.get("_prepared", False):
        p = params
    else:
        p = prepare_ffn_params(params, matmul_dtype)

    dim_hidden, dim_out = p["dim_hidden"], p["dim_out"]
    hp, dp = p["hp"], p["dp"]

    orig_shape = x.shape
    assert orig_shape[-1] == dim_hidden
    out_dtype = x.dtype

    x2d = x.reshape(-1, dim_hidden)
    m = x2d.shape[0]

    kind = _device_kind()
    vmem_cap = _chip_vmem_bytes(kind)
    if block_rows is None:
        block_rows = _default_block_rows(kind)

    # Row (token) tile: multiple of 16 (bf16 sublane packing), never bigger
    # than the padded token count.
    m16 = _round_up(max(m, 1), 16)
    bm = _round_up(min(block_rows, m16), 16)
    # Split one oversized tile across grid steps only on multi-TC chips (v7x);
    # on v5e/v6e (1 TC) an extra grid step is pure per-step overhead.
    if _is_multi_tc(kind) and (m16 // bm) < 2 and m16 >= 256:
        bm = _round_up(pl.cdiv(m16, 2), 16)
    m_pad = _round_up(m16, bm)

    if m_pad != m or hp != dim_hidden:
        x2d = jnp.pad(x2d, ((0, m_pad - m), (0, hp - dim_hidden)))

    mm_it = p["matmul_dtype"].itemsize
    x_it = x2d.dtype.itemsize
    out_it = jnp.dtype(out_dtype).itemsize

    # Fused-path VMEM footprint: grid-invariant weight/bias blocks are DMA'd
    # once but still allocate 2 buffers; x/out row tiles are double buffered;
    # plus the f32 intermediates and their matmul-dtype casts.
    weights = 2 * ((2 * hp * hp + hp * dp) * mm_it + (2 * hp + dp) * 4)
    io = 2 * bm * hp * x_it + 2 * bm * dp * out_it
    interm = bm * (2 * hp + dp) * (4 + mm_it)
    fused_need = int(1.15 * (weights + io + interm)) + (4 << 20)
    budget = int(0.9 * vmem_cap)

    if force_stream or fused_need > budget:
        out = _run_streaming(x2d, p, bm=bm, post_normalize=post_normalize,
                             out_dtype=out_dtype, vmem_cap=vmem_cap,
                             panel=stream_panel)
    else:
        out = _run_fused(x2d, p, bm=bm, post_normalize=post_normalize,
                         out_dtype=out_dtype,
                         vmem_limit=max(fused_need, 16 << 20))

    out = out[:m, :dim_out]
    return out.reshape(orig_shape[:-1] + (dim_out,))


# --------------------------------------------------------------------------
# Reference + init (for the self-test).
# --------------------------------------------------------------------------
def init_ffn_params(key, dim_hidden, dim_out, dtype=jnp.float32):
    """Xavier-uniform weights / uniform biases, matching FFNLayer's shapes.
    (Not bitwise identical to the torch.Generator-seeded init.)"""
    ks = jax.random.split(key, 6)

    def xavier(k, fan_in, fan_out):
        limit = (6.0 / (fan_in + fan_out)) ** 0.5
        return jax.random.uniform(k, (fan_in, fan_out), dtype, -limit, limit)

    def bias(k, fan_in, size):
        bound = 1.0 / (fan_in ** 0.5)
        return jax.random.uniform(k, (size,), dtype, -bound, bound)

    w1 = xavier(ks[0], dim_hidden, dim_hidden)
    b1 = bias(ks[1], dim_hidden, dim_hidden)
    w2 = xavier(ks[2], dim_hidden, dim_hidden)
    b2 = bias(ks[3], dim_hidden, dim_hidden)
    w3 = xavier(ks[4], dim_hidden, dim_out)
    b3 = bias(ks[5], dim_hidden, dim_out)
    return (w1, b1, w2, b2, w3, b3)


def ffn_layer_ref(x, params, post_normalize=True):
    """Pure-JAX reference of FFNLayer.forward (dropout p=0)."""
    w1, b1, w2, b2, w3, b3 = params
    hi = jax.lax.Precision.HIGHEST
    h1 = jnp.maximum(jnp.dot(x, w1, precision=hi) + b1, 0.0)
    h2 = jnp.maximum(jnp.dot(h1, w2, precision=hi) + b2, 0.0)
    h3 = jnp.dot(h2, w3, precision=hi) + b3
    if post_normalize:
        norm = jnp.sqrt(jnp.sum(h3 * h3, axis=-1, keepdims=True))
        h3 = h3 / jnp.maximum(norm, 1e-12)
    return h3


if __name__ == "__main__":
    key = jax.random.PRNGKey(0)
    k_x, k_p, k_x2, k_p2 = jax.random.split(key, 4)

    # Small shapes consistent with the module.
    batch, seq, dim_hidden, dim_out = 2, 8, 32, 16
    x = jax.random.normal(k_x, (batch, seq, dim_hidden), jnp.float32)
    params = init_ffn_params(k_p, dim_hidden, dim_out)
    ref = ffn_layer_ref(x, params, post_normalize=True)

    # Accuracy-check path (f32 matmul operands).
    out_f32 = jax.block_until_ready(
        ffn_layer(x, params, matmul_dtype=jnp.float32))
    assert out_f32.shape == (batch, seq, dim_out)
    assert jnp.allclose(out_f32, ref, atol=1e-3, rtol=1e-3)

    # Default fused bf16 path, with params prepared (padded/cast) once.
    prepared = prepare_ffn_params(params)
    out_bf16 = jax.block_until_ready(ffn_layer(x, prepared))
    assert out_bf16.shape == (batch, seq, dim_out)
    assert jnp.allclose(out_bf16, ref, atol=5e-2, rtol=5e-2)

    # Weight-streaming path (the v7x large-dim_hidden fallback), forced here
    # at a small shape with a 128-wide panel so the K/N-tiled accumulation and
    # the fused finalize (+bias/+relu/+normalize) are actually exercised.
    dh2, do2, m2 = 256, 96, 64
    x2 = jax.random.normal(k_x2, (m2, dh2), jnp.float32)
    params2 = init_ffn_params(k_p2, dh2, do2)
    ref2 = ffn_layer_ref(x2, params2, post_normalize=True)
    out_s = jax.block_until_ready(
        ffn_layer(x2, params2, force_stream=True, stream_panel=128))
    assert out_s.shape == (m2, do2)
    assert jnp.allclose(out_s, ref2, atol=5e-2, rtol=5e-2)

    print("KERNEL_OK")
</pallas_src>

<mosaic_0001>
module attributes {stable_mosaic.version = 11 : i64} {
  func.func @_ffn_fused_kernel(%arg0: i32, %arg1: memref<16x128xf32, #tpu.memory_space<vmem>>, %arg2: memref<128x128xf32, #tpu.memory_space<vmem>>, %arg3: memref<1x128xf32, #tpu.memory_space<vmem>>, %arg4: memref<128x128xf32, #tpu.memory_space<vmem>>, %arg5: memref<1x128xf32, #tpu.memory_space<vmem>>, %arg6: memref<128x128xf32, #tpu.memory_space<vmem>>, %arg7: memref<1x128xf32, #tpu.memory_space<vmem>>, %arg8: memref<16x128xf32, #tpu.memory_space<vmem>>) attributes {dimension_semantics = [#tpu.dimension_semantics<parallel>], iteration_bounds = array<i64: 1>, scalar_prefetch = 0 : i64, scratch_operands = 0 : i64, tpu.core_type = #tpu.core_type<tc>, window_params = [{transform_indices = @transform_0, window_bounds = array<i64: 16, 128>}, {pipeline_mode = #tpu.pipeline_mode<synchronous>, transform_indices = @transform_1, window_bounds = array<i64: 128, 128>}, {pipeline_mode = #tpu.pipeline_mode<synchronous>, transform_indices = @transform_2, window_bounds = array<i64: 1, 128>}, {pipeline_mode = #tpu.pipeline_mode<synchronous>, transform_indices = @transform_3, window_bounds = array<i64: 128, 128>}, {pipeline_mode = #tpu.pipeline_mode<synchronous>, transform_indices = @transform_4, window_bounds = array<i64: 1, 128>}, {pipeline_mode = #tpu.pipeline_mode<synchronous>, transform_indices = @transform_5, window_bounds = array<i64: 128, 128>}, {pipeline_mode = #tpu.pipeline_mode<synchronous>, transform_indices = @transform_6, window_bounds = array<i64: 1, 128>}, {transform_indices = @transform_7, window_bounds = array<i64: 16, 128>}]} {
    %c0 = arith.constant 0 : index
    %c0_0 = arith.constant 0 : index
    %0 = vector.load %arg1[%c0, %c0_0] : memref<16x128xf32, #tpu.memory_space<vmem>>, vector<16x128xf32>
    %c0_1 = arith.constant 0 : index
    %c0_2 = arith.constant 0 : index
    %1 = vector.load %arg2[%c0_1, %c0_2] : memref<128x128xf32, #tpu.memory_space<vmem>>, vector<128x128xf32>
    %cst = arith.constant dense<0.000000e+00> : vector<16x128xf32>
    %2 = tpu.matmul %0, %1, %cst {dimension_numbers = #tpu.dot_dimension_numbers<[1], [0], [0], [1], [0, 0, 1, 1], [], []>} : vector<16x128xf32>, vector<128x128xf32>, vector<16x128xf32> -> vector<16x128xf32>
    %c0_3 = arith.constant 0 : index
    %c0_4 = arith.constant 0 : index
    %3 = vector.load %arg3[%c0_3, %c0_4] : memref<1x128xf32, #tpu.memory_space<vmem>>, vector<1x128xf32>
    %4 = vector.broadcast %3 : vector<1x128xf32> to vector<16x128xf32>
    %5 = arith.addf %2, %4 : vector<16x128xf32>
    %cst_5 = arith.constant 0.000000e+00 : f32
    %6 = vector.broadcast %cst_5 : f32 to vector<16x128xf32>
    %7 = arith.maximumf %5, %6 : vector<16x128xf32>
    %c0_6 = arith.constant 0 : index
    %c0_7 = arith.constant 0 : index
    %8 = vector.load %arg4[%c0_6, %c0_7] : memref<128x128xf32, #tpu.memory_space<vmem>>, vector<128x128xf32>
    %cst_8 = arith.constant dense<0.000000e+00> : vector<16x128xf32>
    %9 = tpu.matmul %7, %8, %cst_8 {dimension_numbers = #tpu.dot_dimension_numbers<[1], [0], [0], [1], [0, 0, 1, 1], [], []>} : vector<16x128xf32>, vector<128x128xf32>, vector<16x128xf32> -> vector<16x128xf32>
    %c0_9 = arith.constant 0 : index
    %c0_10 = arith.constant 0 : index
    %10 = vector.load %arg5[%c0_9, %c0_10] : memref<1x128xf32, #tpu.memory_space<vmem>>, vector<1x128xf32>
    %11 = vector.broadcast %10 : vector<1x128xf32> to vector<16x128xf32>
    %12 = arith.addf %9, %11 : vector<16x128xf32>
    %cst_11 = arith.constant 0.000000e+00 : f32
    %13 = vector.broadcast %cst_11 : f32 to vector<16x128xf32>
    %14 = arith.maximumf %12, %13 : vector<16x128xf32>
    %c0_12 = arith.constant 0 : index
    %c0_13 = arith.constant 0 : index
    %15 = vector.load %arg6[%c0_12, %c0_13] : memref<128x128xf32, #tpu.memory_space<vmem>>, vector<128x128xf32>
    %cst_14 = arith.constant dense<0.000000e+00> : vector<16x128xf32>
    %16 = tpu.matmul %14, %15, %cst_14 {dimension_numbers = #tpu.dot_dimension_numbers<[1], [0], [0], [1], [0, 0, 1, 1], [], []>} : vector<16x128xf32>, vector<128x128xf32>, vector<16x128xf32> -> vector<16x128xf32>
    %c0_15 = arith.constant 0 : index
    %c0_16 = arith.constant 0 : index
    %17 = vector.load %arg7[%c0_15, %c0_16] : memref<1x128xf32, #tpu.memory_space<vmem>>, vector<1x128xf32>
    %18 = vector.broadcast %17 : vector<1x128xf32> to vector<16x128xf32>
    %19 = arith.addf %16, %18 : vector<16x128xf32>
    %20 = arith.mulf %19, %19 : vector<16x128xf32>
    %cst_17 = arith.constant dense<0.000000e+00> : vector<16xf32>
    %21 = vector.multi_reduction <add>, %20, %cst_17 [1] : vector<16x128xf32> to vector<16xf32>
    %22 = vector.shape_cast %21 : vector<16xf32> to vector<16x1xf32>
    %cst_18 = arith.constant 1.000000e-24 : f32
    %23 = vector.broadcast %cst_18 : f32 to vector<16x1xf32>
    %24 = arith.maximumf %22, %23 : vector<16x1xf32>
    %25 = math.rsqrt %24 : vector<16x1xf32>
    %26 = vector.broadcast %25 : vector<16x1xf32> to vector<16x128xf32>
    %27 = arith.mulf %19, %26 : vector<16x128xf32>
    %c0_19 = arith.constant 0 : index
    %c0_20 = arith.constant 0 : index
    %28 = vector.load %arg8[%c0_19, %c0_20] : memref<16x128xf32, #tpu.memory_space<vmem>>, vector<16x128xf32>
    tpu.vector_store %arg8[%c0_19, %c0_20], %27 {strides = array<i32>} : memref<16x128xf32, #tpu.memory_space<vmem>>, vector<16x128xf32>,
    return
  }
  func.func @transform_0(%arg0: i32) -> (i32, i32) {
    %c0_i32 = arith.constant 0 : i32
    %c0_i32_0 = arith.constant 0 : i32
    return %arg0, %c0_i32 : i32, i32
  }
  func.func @transform_1(%arg0: i32) -> (i32, i32) {
    %c0_i32 = arith.constant 0 : i32
    %c0_i32_0 = arith.constant 0 : i32
    %c0_i32_1 = arith.constant 0 : i32
    return %c0_i32, %c0_i32_0 : i32, i32
  }
  func.func @transform_2(%arg0: i32) -> (i32, i32) {
    %c0_i32 = arith.constant 0 : i32
    %c0_i32_0 = arith.constant 0 : i32
    %c0_i32_1 = arith.constant 0 : i32
    return %c0_i32, %c0_i32_0 : i32, i32
  }
  func.func @transform_3(%arg0: i32) -> (i32, i32) {
    %c0_i32 = arith.constant 0 : i32
    %c0_i32_0 = arith.constant 0 : i32
    %c0_i32_1 = arith.constant 0 : i32
    return %c0_i32, %c0_i32_0 : i32, i32
  }
  func.func @transform_4(%arg0: i32) -> (i32, i32) {
    %c0_i32 = arith.constant 0 : i32
    %c0_i32_0 = arith.constant 0 : i32
    %c0_i32_1 = arith.constant 0 : i32
    return %c0_i32, %c0_i32_0 : i32, i32
  }
  func.func @transform_5(%arg0: i32) -> (i32, i32) {
    %c0_i32 = arith.constant 0 : i32
    %c0_i32_0 = arith.constant 0 : i32
    %c0_i32_1 = arith.constant 0 : i32
    return %c0_i32, %c0_i32_0 : i32, i32
  }
  func.func @transform_6(%arg0: i32) -> (i32, i32) {
    %c0_i32 = arith.constant 0 : i32
    %c0_i32_0 = arith.constant 0 : i32
    %c0_i32_1 = arith.constant 0 : i32
    return %c0_i32, %c0_i32_0 : i32, i32
  }
  func.func @transform_7(%arg0: i32) -> (i32, i32) {
    %c0_i32 = arith.constant 0 : i32
    %c0_i32_0 = arith.constant 0 : i32
    return %arg0, %c0_i32 : i32, i32
  }
}

</mosaic_0001>

<bundles_post_ra>
// kernel: tpu_custom_call.1
= control target key start
LH: loop header
LB: loop body
LE: loop exit
PB: predicated region body
PF: predicated region fallthrough
CT: control target
= control target key end

     0   :  { %12 = vsyncpa [#allocation3], 0  ;;  %s782_s0 = inlined_call_operand.hbm [shape: f32[16,128], index: 0, kind: input, shape index: {}]   ;;  %s783_s1 = inlined_call_operand.hbm [shape: f32[128,128], index: 1, kind: input, shape index: {}]   ;;  %s784_s2 = inlined_call_operand.vmem [shape: f32[1,128], index: 2, kind: input, shape index: {}]   ;;  %s785_s3 = inlined_call_operand.hbm [shape: f32[128,128], index: 3, kind: input, shape index: {}]   ;;  %s786_s4 = inlined_call_operand.vmem [shape: f32[1,128], index: 4, kind: input, shape index: {}]   ;;  %s787_s5 = inlined_call_operand.hbm [shape: f32[128,128], index: 5, kind: input, shape index: {}]   ;;  %s788_s6 = inlined_call_operand.vmem [shape: f32[1,128], index: 6, kind: input, shape index: {}]   ;;  %s789_s7 = inlined_call_operand.hbm [shape: f32[16,128], index: 7, kind: output, shape index: {}]  }
   0x1   :  { %13 = vsyncpa [#allocation6], 0 }
   0x2   :  { %14 = vsyncpa [#allocation9], 0 }
   0x3   :  { %15 = vsyncpa [#allocation4], 0  ;;  %s696_s24 = smov [#allocation5]   ;;  %s697_s26 = smov [#allocation2]  }
   0x4   :  { %s33_s25 = sshll.u32 %s696_s24, 4  ;;  %s21_s27 = sshll.u32 %s697_s26, 4  ;;  %s34_s25 = int_to_ptr.vmem [resolvable:$true] %s33_s25  ;;  %s22_s27 = int_to_ptr.vmem [resolvable:$true] %s21_s27 }
   0x5   :  { %s596_s28 = scalar_lea.vmem %s34_s25, 2048  ;;  %p601_p1 = scmp.lt.s32.totalorder %s34_s25, %s34_s25 }
   0x6   :  { %p597_p0 = scmp.ne.s32.totalorder %s34_s25, %s596_s28  ;;  %p602_p2 = scmp.lt.s32.totalorder %s596_s28, %s596_s28 }
   0x8   :  { %p603_p3 = por %p602_p2, %p601_p1 }
   0xa   :  { %p604_p4 = pnand %p603_p3, %p597_p0 }
   0xc   :  { %607 = shalt.err (!%p604_p4)
}
   0xd   :  { %s698_s29 = smov 128   ;;  %s699_s30 = smov 8  }
   0xe   :  { %39 = dma.hbm_to_vmem [thread:$0]  %s783_s1, 2048, %s34_s25, [#allocation6], %s698_s29, %s698_s29, %s699_s30  }
   0xf   :  { %s616_s10 = scalar_lea.vmem %s22_s27, 256  ;;  %p621_p6 = scmp.lt.s32.totalorder %s22_s27, %s22_s27 }
  0x10   :  { %p617_p5 = scmp.ne.s32.totalorder %s22_s27, %s616_s10  ;;  %p622_p7 = scmp.lt.s32.totalorder %s616_s10, %s616_s10 }
  0x12   :  { %p623_p8 = por %p622_p7, %p621_p6 }
  0x14   :  { %p624_p9 = pnand %p623_p8, %p617_p5 }
  0x16   :  { %627 = shalt.err (!%p624_p9)
}
  0x17   :  { %27 = dma.hbm_to_vmem [thread:$0]  %s782_s0, 256, %s22_s27, [#allocation3], %s698_s29, %s698_s29, %s699_s30  }
  0x18   :  { %s700_s13 = smov [#allocation7]   ;;  %s701_s15 = smov [#allocation8]  }
  0x19   :  { %s47_s14 = sshll.u32 %s700_s13, 4  ;;  %s61_s16 = sshll.u32 %s701_s15, 4  ;;  %s48_s14 = int_to_ptr.vmem [resolvable:$true] %s47_s14  ;;  %s62_s16 = int_to_ptr.vmem [resolvable:$true] %s61_s16 }
  0x1a   :  { %s636_s1 = scalar_lea.vmem %s48_s14, 2048  ;;  %p641_p11 = scmp.lt.s32.totalorder %s48_s14, %s48_s14 }
  0x1b   :  { %p637_p10 = scmp.ne.s32.totalorder %s48_s14, %s636_s1  ;;  %p642_p12 = scmp.lt.s32.totalorder %s636_s1, %s636_s1 }
  0x1d   :  { %p643_p13 = por %p642_p12, %p641_p11 }
  0x1f   :  { %p644_p0 = pnand %p643_p13, %p637_p10 }
  0x21   :  { %647 = shalt.err (!%p644_p0)
}
  0x22   :  { %53 = dma.hbm_to_vmem [thread:$0]  %s785_s3, 2048, %s48_s14, [#allocation6], %s698_s29, %s698_s29, %s699_s30  }
  0x23   :  { %s656_s0 = scalar_lea.vmem %s62_s16, 2048  ;;  %p661_p2 = scmp.lt.s32.totalorder %s62_s16, %s62_s16 }
  0x24   :  { %p657_p1 = scmp.ne.s32.totalorder %s62_s16, %s656_s0  ;;  %p662_p3 = scmp.lt.s32.totalorder %s656_s0, %s656_s0 }
  0x26   :  { %p663_p4 = por %p662_p3, %p661_p2 }
  0x28   :  { %p664_p5 = pnand %p663_p4, %p657_p1 }
  0x2a   :  { %667 = shalt.err (!%p664_p5)
}
  0x2b   :  { %67 = dma.hbm_to_vmem [thread:$0]  %s787_s5, 2048, %s62_s16, [#allocation9], %s698_s29, %s698_s29, %s699_s30  }
  0x2c   :  { %688 = dma.done.wait [#allocation3], 256  }
  0x2d   :  { %689 = vsyncadd [#allocation3], 4294967040 }
  0x2e   :  { %690 = dma.done.wait [#allocation6], 4096  }
  0x2f   :  { %691 = vsyncadd [#allocation6], 4294963200 }
  0x30   :  { %692 = dma.done.wait [#allocation9], 2048  }
  0x31   :  { %693 = vsyncadd [#allocation9], 4294965248  ;;  %v99_v0 = vld [vmem:[#allocation5 + $0x78] sm:$0xff]  ;;  %v98_v1 = vld [vmem:[#allocation5 + $0x70] sm:$0xff] }
  0x32   :  { %472 = vmatprep.subr.mxu0 %v99_v0  ;;  %v97_v2 = vld [vmem:[#allocation5 + $0x68] sm:$0xff]  ;;  %v96_v3 = vld [vmem:[#allocation5 + $0x60] sm:$0xff]  ;;  %v82_v4 = vld [vmem:[#allocation2] sm:$0xff] }
  0x33   :  { %473 = vmatpush3.msra.mxu0 %v99_v0  ;;  %v95_v5 = vld [vmem:[#allocation5 + $0x58] sm:$0xff]  ;;  %504 = vmatprep.mubr.f32.mxu0 %v82_v4  ;;  %v198_v7 = vld [vmem:[#allocation7 + $0x70] sm:$0xff]  ;;  %v197_v9 = vld [vmem:[#allocation7 + $0x68] sm:$0xff] }
  0x34   :  { %474 = vmatprep.subr.mxu0 %v98_v1  ;;  %v199_v6 = vld [vmem:[#allocation7 + $0x78] sm:$0xff]  ;;  %v94_v8 = vld [vmem:[#allocation5 + $0x50] sm:$0xff]  ;;  %v93_v10 = vld [vmem:[#allocation5 + $0x48] sm:$0xff] }
  0x35   :  { %475 = vmatpush3.msra.mxu0 %v98_v1  ;;  %507 = vmatprep.subr.mxu1 %v199_v6  ;;  %v196_v11 = vld [vmem:[#allocation7 + $0x60] sm:$0xff]  ;;  %v195_v13 = vld [vmem:[#allocation7 + $0x58] sm:$0xff]  ;;  %v194_v15 = vld [vmem:[#allocation7 + $0x50] sm:$0xff] }
  0x36   :  { %476 = vmatprep.subr.mxu0 %v97_v2  ;;  %508 = vmatpush3.msra.mxu1 %v199_v6  ;;  %v92_v12 = vld [vmem:[#allocation5 + $0x40] sm:$0xff]  ;;  %v91_v14 = vld [vmem:[#allocation5 + $0x38] sm:$0xff]  ;;  %v90_v16 = vld [vmem:[#allocation5 + $0x30] sm:$0xff] }
  0x37   :  { %477 = vmatpush3.msra.mxu0 %v97_v2  ;;  %509 = vmatprep.subr.mxu1 %v198_v7  ;;  %v193_v17 = vld [vmem:[#allocation7 + $0x48] sm:$0xff]  ;;  %v192_v19 = vld [vmem:[#allocation7 + $0x40] sm:$0xff]  ;;  %v191_v21 = vld [vmem:[#allocation7 + $0x38] sm:$0xff] }
  0x38   :  { %478 = vmatprep.subr.mxu0 %v96_v3  ;;  %510 = vmatpush3.msra.mxu1 %v198_v7  ;;  %v89_v18 = vld [vmem:[#allocation5 + $0x28] sm:$0xff]  ;;  %v88_v20 = vld [vmem:[#allocation5 + $0x20] sm:$0xff]  ;;  %v87_v22 = vld [vmem:[#allocation5 + $0x18] sm:$0xff] }
  0x39   :  { %479 = vmatpush3.msra.mxu0 %v96_v3  ;;  %511 = vmatprep.subr.mxu1 %v197_v9  ;;  %v190_v23 = vld [vmem:[#allocation7 + $0x30] sm:$0xff]  ;;  %v189_v25 = vld [vmem:[#allocation7 + $0x28] sm:$0xff]  ;;  %v188_v27 = vld [vmem:[#allocation7 + $0x20] sm:$0xff] }
  0x3a   :  { %480 = vmatprep.subr.mxu0 %v95_v5  ;;  %512 = vmatpush3.msra.mxu1 %v197_v9  ;;  %v86_v24 = vld [vmem:[#allocation5 + $0x10] sm:$0xff]  ;;  %v85_v26 = vld [vmem:[#allocation5 + $0x8] sm:$0xff]  ;;  %v84_v28 = vld [vmem:[#allocation5] sm:$0xff] }
  0x3b   :  { %481 = vmatpush3.msra.mxu0 %v95_v5  ;;  %513 = vmatprep.subr.mxu1 %v196_v11  ;;  %v83_v29 = vld [vmem:[#allocation2 + $0x8] sm:$0xff]  ;;  %v186_v31 = vld [vmem:[#allocation7 + $0x10] sm:$0xff]  ;;  %v185_v32 = vld [vmem:[#allocation7 + $0x8] sm:$0xff] }
  0x3c   :  { %482 = vmatprep.subr.mxu0 %v94_v8  ;;  %514 = vmatpush3.msra.mxu1 %v196_v11  ;;  %v187_v30 = vld [vmem:[#allocation7 + $0x18] sm:$0xff]  ;;  %v184_v33 = vld [vmem:[#allocation7] sm:$0xff]  ;;  %v298_v35 = vld [vmem:[#allocation8 + $0x70] sm:$0xff] }
  0x3d   :  { %483 = vmatpush3.msra.mxu0 %v94_v8  ;;  %515 = vmatprep.subr.mxu1 %v195_v13  ;;  %v299_v34 = vld [vmem:[#allocation8 + $0x78] sm:$0xff]  ;;  %v297_v36 = vld [vmem:[#allocation8 + $0x68] sm:$0xff]  ;;  %v296_v37 = vld [vmem:[#allocation8 + $0x60] sm:$0xff] }
  0x3e   :  { %484 = vmatprep.subr.mxu0 %v93_v10  ;;  %516 = vmatpush3.msra.mxu1 %v195_v13  ;;  %v295_v38 = vld [vmem:[#allocation8 + $0x58] sm:$0xff]  ;;  %v294_v39 = vld [vmem:[#allocation8 + $0x50] sm:$0xff]  ;;  %v293_v40 = vld [vmem:[#allocation8 + $0x48] sm:$0xff] }
  0x3f   :  { %485 = vmatpush3.msra.mxu0 %v93_v10  ;;  %517 = vmatprep.subr.mxu1 %v194_v15  ;;  %v292_v41 = vld [vmem:[#allocation8 + $0x40] sm:$0xff]  ;;  %v291_v42 = vld [vmem:[#allocation8 + $0x38] sm:$0xff]  ;;  %v290_v43 = vld [vmem:[#allocation8 + $0x30] sm:$0xff] }
  0x40   :  { %486 = vmatprep.subr.mxu0 %v92_v12  ;;  %518 = vmatpush3.msra.mxu1 %v194_v15  ;;  %v289_v44 = vld [vmem:[#allocation8 + $0x28] sm:$0xff]  ;;  %v288_v45 = vld [vmem:[#allocation8 + $0x20] sm:$0xff]  ;;  %v415_v46 = vld [vmem:[%s784_s2] ss:$0 sm:$0xff] }
  0x41   :  { %487 = vmatpush3.msra.mxu0 %v92_v12  ;;  %519 = vmatprep.subr.mxu1 %v193_v17  ;;  %v287_v53 = vld [vmem:[#allocation8 + $0x18] sm:$0xff]  ;;  %v286_v54 = vld [vmem:[#allocation8 + $0x10] sm:$0xff]  ;;  %v285_v55 = vld [vmem:[#allocation8 + $0x8] sm:$0xff] }
  0x42   :  { %488 = vmatprep.subr.mxu0 %v91_v14  ;;  %520 = vmatpush3.msra.mxu1 %v193_v17  ;;  %v284_v56 = vld [vmem:[#allocation8] sm:$0xff]  ;;  %v416_v57 = vld [vmem:[%s786_s4] ss:$0 sm:$0xff]  ;;  %s702_s4 = smov [#allocation10]  }
  0x43   :  { %489 = vmatpush3.msra.mxu0 %v91_v14  ;;  %521 = vmatprep.subr.mxu1 %v192_v19  ;;  %v417_v1 = vld [vmem:[%s788_s6] ss:$0 sm:$0xff]  ;;  %s401_s24 = sshll.u32 %s702_s4, 4  ;;  %s402_s24 = int_to_ptr.vmem [resolvable:$true] %s401_s24 }
  0x44   :  { %490 = vmatprep.subr.mxu0 %v90_v16  ;;  %522 = vmatpush3.msra.mxu1 %v192_v19  ;;  %s668_s6 = scalar_lea.vmem %s402_s24, 256  ;;  %p673_p7 = scmp.lt.s32.totalorder %s402_s24, %s402_s24 }
  0x45   :  { %491 = vmatpush3.msra.mxu0 %v90_v16  ;;  %523 = vmatprep.subr.mxu1 %v191_v21  ;;  %p669_p6 = scmp.ne.s32.totalorder %s402_s24, %s668_s6  ;;  %p674_p8 = scmp.lt.s32.totalorder %s668_s6, %s668_s6 }
  0x46   :  { %492 = vmatprep.subr.mxu0 %v89_v18  ;;  %524 = vmatpush3.msra.mxu1 %v191_v21 }
  0x47   :  { %493 = vmatpush3.msra.mxu0 %v89_v18  ;;  %525 = vmatprep.subr.mxu1 %v190_v23  ;;  %p675_p9 = por %p674_p8, %p673_p7 }
  0x48   :  { %494 = vmatprep.subr.mxu0 %v88_v20  ;;  %526 = vmatpush3.msra.mxu1 %v190_v23 }
  0x49   :  { %495 = vmatpush3.msra.mxu0 %v88_v20  ;;  %527 = vmatprep.subr.mxu1 %v189_v25  ;;  %p676_p10 = pnand %p675_p9, %p669_p6 }
  0x4a   :  { %496 = vmatprep.subr.mxu0 %v87_v22  ;;  %528 = vmatpush3.msra.mxu1 %v189_v25 }
  0x4b   :  { %497 = vmatpush3.msra.mxu0 %v87_v22  ;;  %529 = vmatprep.subr.mxu1 %v188_v27 }
  0x4c   :  { %498 = vmatprep.subr.mxu0 %v86_v24  ;;  %530 = vmatpush3.msra.mxu1 %v188_v27 }
  0x4d   :  { %499 = vmatpush3.msra.mxu0 %v86_v24  ;;  %531 = vmatprep.subr.mxu1 %v187_v30 }
  0x4e   :  { %500 = vmatprep.subr.mxu0 %v85_v26  ;;  %532 = vmatpush3.msra.mxu1 %v187_v30 }
  0x4f   :  { %501 = vmatpush3.msra.mxu0 %v85_v26  ;;  %533 = vmatprep.subr.mxu1 %v186_v31 }
  0x50   :  { %502 = vmatprep.subr.mxu0 %v84_v28  ;;  %534 = vmatpush3.msra.mxu1 %v186_v31 }
  0x51   :  { %503 = vmatpush3.msra.mxu0 %v84_v28  ;;  %535 = vmatprep.subr.mxu1 %v185_v32 }
  0x52   :  { %505 = vmatmul.mubr.f32.vlgmr.msra.gmra.mxu0 %v83_v29  ;;  %536 = vmatpush3.msra.mxu1 %v185_v32 }
  0x53   :  { %537 = vmatprep.subr.mxu1 %v184_v33  ;;  %542 = vmatprep.subr.mxu0 %v299_v34 }
  0x54   :  { %538 = vmatpush3.msra.mxu1 %v184_v33  ;;  %543 = vmatpush3.msra.mxu0 %v299_v34 }
  0x55   :  { %544 = vmatprep.subr.mxu0 %v298_v35 }
  0x56   :  { %545 = vmatpush3.msra.mxu0 %v298_v35 }
  0x57   :  { %546 = vmatprep.subr.mxu0 %v297_v36 }
  0x58   :  { %547 = vmatpush3.msra.mxu0 %v297_v36 }
  0x59   :  { %548 = vmatprep.subr.mxu0 %v296_v37 }
  0x5a   :  { %549 = vmatpush3.msra.mxu0 %v296_v37 }
  0x5b   :  { %550 = vmatprep.subr.mxu0 %v295_v38 }
  0x5c   :  { %551 = vmatpush3.msra.mxu0 %v295_v38 }
  0x5d   :  { %552 = vmatprep.subr.mxu0 %v294_v39 }
  0x5e   :  { %553 = vmatpush3.msra.mxu0 %v294_v39 }
  0x5f   :  { %554 = vmatprep.subr.mxu0 %v293_v40 }
  0x60   :  { %555 = vmatpush3.msra.mxu0 %v293_v40 }
  0x61   :  { %556 = vmatprep.subr.mxu0 %v292_v41 }
  0x62   :  { %557 = vmatpush3.msra.mxu0 %v292_v41 }
  0x63   :  { %558 = vmatprep.subr.mxu0 %v291_v42 }
  0x64   :  { %559 = vmatpush3.msra.mxu0 %v291_v42 }
  0x65   :  { %560 = vmatprep.subr.mxu0 %v290_v43 }
  0x66   :  { %561 = vmatpush3.msra.mxu0 %v290_v43 }
  0x67   :  { %562 = vmatprep.subr.mxu0 %v289_v44 }
  0x68   :  { %563 = vmatpush3.msra.mxu0 %v289_v44 }
  0x69   :  { %564 = vmatprep.subr.mxu0 %v288_v45 }
  0x6a   :  { %565 = vmatpush3.msra.mxu0 %v288_v45 }
  0x6b   :  { %566 = vmatprep.subr.mxu0 %v287_v53 }
  0x6c   :  { %567 = vmatpush3.msra.mxu0 %v287_v53 }
  0x6d   :  { %568 = vmatprep.subr.mxu0 %v286_v54 }
  0x6e   :  { %569 = vmatpush3.msra.mxu0 %v286_v54 }
  0x6f   :  { %570 = vmatprep.subr.mxu0 %v285_v55 }
  0x70   :  { %571 = vmatpush3.msra.mxu0 %v285_v55 }
  0x71   :  { %572 = vmatprep.subr.mxu0 %v284_v56 }
  0x72   :  { %573 = vmatpush3.msra.mxu0 %v284_v56 }
 0x112   :  { %v506_v47 = vpop.f32.mrf.mxu0 }
 0x113   :  { %v179_v48 = vadd.f32 %v506_v47, %v415_v46 }
 0x114   :  { %v173_v49 = vpop.f32.mrf.mxu0 }
 0x115   :  { %v174_v50 = vadd.f32 %v415_v46, %v173_v49  ;;  %v183_v52 = vmax.f32 %v179_v48, 0.0 }
 0x117   :  { %v182_v51 = vmax.f32 %v174_v50, 0.0 }
 0x119   :  { %539 = vmatprep.mubr.f32.mxu1 %v182_v51 }
 0x11a   :  { %540 = vmatmul.mubr.f32.vlgmr.msra.gmra.mxu1 %v183_v52 }
 0x1da   :  { %v541_v58 = vpop.f32.mrf.mxu1 }
 0x1db   :  { %v279_v59 = vadd.f32 %v541_v58, %v416_v57 }
 0x1dc   :  { %v273_v60 = vpop.f32.mrf.mxu1 }
 0x1dd   :  { %v274_v61 = vadd.f32 %v416_v57, %v273_v60  ;;  %v283_v63 = vmax.f32 %v279_v59, 0.0 }
 0x1df   :  { %v282_v62 = vmax.f32 %v274_v61, 0.0 }
 0x1e1   :  { %574 = vmatprep.mubr.f32.mxu0 %v282_v62 }
 0x1e2   :  { %575 = vmatmul.mubr.f32.vlgmr.msra.gmra.mxu0 %v283_v63 }
 0x2a2   :  { %v576_v0 = vpop.f32.mrf.mxu0 }
 0x2a3   :  { %v379_v4 = vadd.f32 %v576_v0, %v417_v1 }
 0x2a4   :  { %v373_v2 = vpop.f32.mrf.mxu0 }
 0x2a5   :  { %v374_v3 = vadd.f32 %v417_v1, %v373_v2  ;;  %v383_v6 = vmul.f32 %v379_v4, %v379_v4 }
 0x2a7   :  { %v382_v5 = vmul.f32 %v374_v3, %v374_v3 }
 0x2a9   :  { %384 = vadd.xlane.f32.xlu0 %v382_v5 }
 0x2ad   :  { %386 = vadd.xlane.f32.xlu0 %v383_v6 }
 0x332   :  { %v385_v7 = vpop.xlane.xlu0 %384 }
 0x333   :  { %v388_v8 = vmax.f32 %v385_v7, 1e-24 }
 0x335   :  { %584 = vrsqrt.f32 %v388_v8 }
 0x336   :  { %v387_v9 = vpop.xlane.xlu0 %386 }
 0x337   :  { %v389_v10 = vmax.f32 %v387_v9, 1e-24 }
 0x339   :  { %586 = vrsqrt.f32 %v389_v10 }
 0x342   :  { %v585_v11 = vpop.eup %584 }
 0x343   :  { %v392_v12 = vmul.f32 %v585_v11, %v374_v3 }
 0x345   :  { %394 = vst [vmem:[#allocation10] sm:$0xff] %v392_v12 }
 0x346   :  { %v587_v13 = vpop.eup %586 }
 0x347   :  { %v393_v14 = vmul.f32 %v587_v13, %v379_v4 }
 0x349   :  { %395 = vst [vmem:[#allocation10 + $0x8] sm:$0xff] %v393_v14 }
 0x34a   :  { %679 = shalt.err (!%p676_p10)
}
 0x34b   :  { %407 = dma.vmem_to_hbm [thread:$0]  %s402_s24, 256, %s789_s7, [#allocation4], %s698_s29, %s698_s29, %s699_s30  }
 0x34c   :  { %694 = dma.done.wait [#allocation4], 256  }
 0x34d   :  { %695 = vsyncadd [#allocation4], 4294967040 }
 0x34e   :  { %411 = vsyncpa [#allocation3], 1 }
 0x34f   :  { %412 = vsyncpa [#allocation6], 1 }
 0x350   :  { %413 = vsyncpa [#allocation9], 1 }
 0x351   :  { %414 = vsyncpa [#allocation4], 1 }

</bundles_post_ra>
